<compile_context>
chip_gen: v5e
topology: v5e:2x2
jax: 0.10.0
libtpu: 0.0.40
codegen_flags: <defaults>
</compile_context>

<pallas_src>
import functools

import jax
import jax.numpy as jnp
from jax.experimental import pallas as pl
from jax.experimental.pallas import tpu as pltpu


# -------------------------------------------------------------------- chip-aware tuning
def _detect_chip():
    try:
        kind = jax.devices()[0].device_kind.lower()
    except Exception:
        kind = ""
    is_v7 = "v7" in kind
    # dual-TC chips want two parallel grid tiles even when M collapses to one tile
    dual_tc = is_v7 or ("v4" in kind) or ("v5p" in kind)
    # 128-MiB-VMEM generations can afford a larger scoped-VMEM budget; v7x has 64 MiB/TC
    big_vmem = (not is_v7) and any(t in kind for t in ("v4", "v5", "v6"))
    return dual_tc, big_vmem


_DUAL_TC, _BIG_VMEM = _detect_chip()
_VMEM_LIMIT_BYTES = (96 if _BIG_VMEM else 48) * 1024 * 1024


# ----------------------------------------------------------------------- small helpers
def _round_up(x, m):
    return ((x + m - 1) // m) * m


def _kn_tiles(K, N):
    """Tile sizes for the K (contraction) and N (output-channel) GEMM axes.

    * K: a single tile when it comfortably fits in VMEM (drops the accumulator scratch and
      the pl.when epilogue), otherwise 512-deep tiles.
    * N: 256-wide lane tiles for the 256-wide MXU.  N==256 is split into two 128 tiles only
      on dual-TC chips (v7x) so the megacore keeps a second parallel axis when M collapses.
    """
    tk = _round_up(K, 128) if K <= 2304 else 512
    if N <= 128:
        tn = N
    elif N == 256 and _DUAL_TC:
        tn = 128
    else:
        tn = 256
    return tk, tn


def _m_tile(M):
    # bf16 A tiles want sublane multiples of 16; tiny deep-layer M becomes one full-dim tile
    # (no padding).  Large M uses 512-row tiles to amortize per-grid-step overhead.
    if M <= 16:
        return M
    return min(512, _round_up(M, 16))


# ----------------------------------------------------------------------------- kernels
def _mm_kernel_single_k(*refs, relu, fuse_add):
    """out = [relu]( (A @ B) * scale + bias [+ residual] ), whole K in one tile."""
    if fuse_add:
        a_ref, b_ref, sb_ref, r_ref, o_ref = refs
    else:
        a_ref, b_ref, sb_ref, o_ref = refs
        r_ref = None
    out = jnp.dot(a_ref[...], b_ref[...], preferred_element_type=jnp.float32)
    out = out * sb_ref[0:1, :] + sb_ref[1:2, :]
    if r_ref is not None:
        out = out + r_ref[...].astype(jnp.float32)   # residual add kept in f32
    if relu:
        out = jnp.maximum(out, 0.0)
    o_ref[...] = out.astype(o_ref.dtype)


def _mm_kernel_multi_k(*refs, relu, fuse_add):
    """K-tiled variant with an f32 VMEM accumulator.  Grid = (par, par, K/TK)."""
    if fuse_add:
        a_ref, b_ref, sb_ref, r_ref, o_ref, acc_ref = refs
    else:
        a_ref, b_ref, sb_ref, o_ref, acc_ref = refs
        r_ref = None

    @pl.when(pl.program_id(2) == 0)
    def _():
        acc_ref[...] = jnp.zeros_like(acc_ref)

    acc_ref[...] += jnp.dot(a_ref[...], b_ref[...], preferred_element_type=jnp.float32)

    @pl.when(pl.program_id(2) == pl.num_programs(2) - 1)
    def _():
        out = acc_ref[...] * sb_ref[0:1, :] + sb_ref[1:2, :]
        if r_ref is not None:
            out = out + r_ref[...].astype(jnp.float32)
        if relu:
            out = jnp.maximum(out, 0.0)
        o_ref[...] = out.astype(o_ref.dtype)


def _maxpool_kernel(x_ref, o_ref, *, ho, wo):
    # x_ref: (4, Hh, Wh, C) even/odd (row, col) split of the zero-padded input of one image.
    # Input is post-ReLU (>= 0), so zero padding gives the same max as -inf padding.
    # TODO(synk): fold the column-parity planes into the channel axis so the last dim is
    # 2*C = 128 lanes (lane-dense loads/stores); small win, left for a later pass.
    r = None
    for dy in range(3):
        for dx in range(3):
            par = (dy % 2) * 2 + (dx % 2)
            v = x_ref[par, pl.ds(dy // 2, ho), pl.ds(dx // 2, wo), :]
            r = v if r is None else jnp.maximum(r, v)
    o_ref[0] = r


def _avgpool_kernel(x_ref, o_ref):
    # x_ref: (1, H*W, C) bf16 -> global spatial mean accumulated in f32 (AdaptiveAvgPool2d(1)).
    o_ref[...] = jnp.mean(x_ref[...].astype(jnp.float32), axis=1)


# ----------------------------------------------------------------------- matmul driver
def _matmul_bn(a, b_packed, sb, residual, relu):
    """a: (M, K) bf16, b_packed: (Kp, Np) bf16, sb: (2, N) f32, residual: (M, N) bf16|None.

    Returns (M, N) bf16 = relu((a @ b) * scale + bias [+ residual])."""
    M, K = a.shape
    Kp, Np = b_packed.shape
    N = sb.shape[1]
    tk, tn = _kn_tiles(K, N)
    tm = _m_tile(M)
    Mp = _round_up(M, tm)
    gm, gn, gk = Mp // tm, Np // tn, Kp // tk

    # Pads are lazy: for ResNet shapes M/N tiles are exact and K is 128-aligned for almost
    # every conv, so these are no-ops (no extra HBM pass) except the stem / first layer1 convs.
    a_p = a if (Mp == M and Kp == K) else jnp.pad(a, ((0, Mp - M), (0, Kp - K)))
    sb_p = sb if Np == N else jnp.pad(sb, ((0, 0), (0, Np - N)))
    fuse_add = residual is not None

    # Lead with whichever parallel axis has more tiles (keeps both v7x TensorCores busy
    # in the deep layers where M collapses to a single tile).
    if gn >= gm:
        grid = (gn, gm, gk)
        a_map = lambda j, i, k: (i, k)
        b_map = lambda j, i, k: (k, j)
        s_map = lambda j, i, k: (0, j)
        o_map = lambda j, i, k: (i, j)
    else:
        grid = (gm, gn, gk)
        a_map = lambda i, j, k: (i, k)
        b_map = lambda i, j, k: (k, j)
        s_map = lambda i, j, k: (0, j)
        o_map = lambda i, j, k: (i, j)

    # Deep layers: with only a handful of M rows the weight DMA is the exposed critical path,
    # so triple-buffer the weight stream.
    b_kwargs = {}
    if M <= 64 and gn * gk >= 3:
        b_kwargs["pipeline_mode"] = pl.Buffered(3)

    in_specs = [
        pl.BlockSpec((tm, tk), a_map),
        pl.BlockSpec((tk, tn), b_map, **b_kwargs),
        pl.BlockSpec((2, tn), s_map),        # scale/bias combined in one side stream
    ]
    operands = [a_p, b_packed, sb_p]
    if fuse_add:
        # residual read (bf16) with the exact same (i, j) index map as the output tile
        r = residual
        if Mp != M or Np != N:
            r = jnp.pad(r, ((0, Mp - M), (0, Np - N)))
        in_specs.append(pl.BlockSpec((tm, tn), o_map))
        operands.append(r)

    if gk == 1:
        kernel = functools.partial(_mm_kernel_single_k, relu=relu, fuse_add=fuse_add)
        scratch = []
    else:
        kernel = functools.partial(_mm_kernel_multi_k, relu=relu, fuse_add=fuse_add)
        scratch = [pltpu.VMEM((tm, tn), jnp.float32)]

    out = pl.pallas_call(
        kernel,
        out_shape=jax.ShapeDtypeStruct((Mp, Np), jnp.bfloat16),   # bf16 activation writeback
        grid_spec=pltpu.PrefetchScalarGridSpec(
            num_scalar_prefetch=0,
            grid=grid,
            in_specs=in_specs,
            out_specs=pl.BlockSpec((tm, tn), o_map),
            scratch_shapes=scratch,
        ),
        compiler_params=pltpu.CompilerParams(
            dimension_semantics=("parallel", "parallel", "arbitrary"),
            vmem_limit_bytes=_VMEM_LIMIT_BYTES,
        ),
    )(*operands)
    if Mp != M or Np != N:
        out = out[:M, :N]
    return out


# --------------------------------------------------------------------------- conv glue
def _im2col(x, k, s, p):
    """NHWC -> (N*Ho*Wo, k*k*C) patches, window-major / channel-minor (bf16 in, bf16 out)."""
    N, H, W, C = x.shape
    if p:
        x = jnp.pad(x, ((0, 0), (p, p), (p, p), (0, 0)))
    Ho = (H + 2 * p - k) // s + 1
    Wo = (W + 2 * p - k) // s + 1
    cols = []
    for dy in range(k):
        for dx in range(k):
            cols.append(x[:, dy:dy + (Ho - 1) * s + 1:s, dx:dx + (Wo - 1) * s + 1:s, :])
    patches = jnp.stack(cols, axis=3)            # (N, Ho, Wo, k*k, C)
    return patches.reshape(N * Ho * Wo, k * k * C), (N, Ho, Wo)


@functools.partial(jax.jit, static_argnames=("ksize", "stride", "pad", "relu"))
def _conv_bn_impl(x, w, sb, residual, *, ksize, stride, pad, relu):
    """Conv2d + folded BN + optional fused residual-add + ReLU.  x: NHWC (cast to bf16)."""
    x = x.astype(jnp.bfloat16)   # no-op after the first conv (previous layer emits bf16)
    N, H, W, Cin = x.shape
    if ksize == 1:
        if stride > 1:
            x = x[:, ::stride, ::stride, :]
        _, Ho, Wo, _ = x.shape
        a = x.reshape(N * Ho * Wo, Cin)
    else:
        # TODO(synk): replace im2col with an implicit-GEMM index_map (k*k accumulated
        # sub-matmuls) so the 9x patch tensor is never materialized in HBM.
        a, (N, Ho, Wo) = _im2col(x, ksize, stride, pad)
    res2d = None if residual is None else residual.reshape(N * Ho * Wo, -1)
    out = _matmul_bn(a, w, sb, res2d, relu)
    return out.reshape(N, Ho, Wo, -1)


def conv_bn(x, p, stride, pad, relu, residual=None):
    return _conv_bn_impl(x, p["w"], p["sb"], residual,
                         ksize=p["ksize"], stride=stride, pad=pad, relu=relu)


@jax.jit
def maxpool_3x3_s2(x):
    """3x3 / stride-2 / pad-1 max pool (ResNet stem), NHWC bf16, Pallas kernel per image."""
    N, H, W, C = x.shape
    Ho = (H + 2 - 3) // 2 + 1
    Wo = (W + 2 - 3) // 2 + 1
    Hp = _round_up(H + 2, 2)
    Wp = _round_up(W + 2, 2)
    xp = jnp.pad(x, ((0, 0), (1, Hp - H - 1), (1, Wp - W - 1), (0, 0)))
    Hh, Wh = Hp // 2, Wp // 2
    # even/odd split: xe[n*4 + ph*2 + pw, hh, wh, c] == xp[n, 2*hh+ph, 2*wh+pw, c]
    xe = xp.reshape(N, Hh, 2, Wh, 2, C).transpose(0, 2, 4, 1, 3, 5).reshape(N * 4, Hh, Wh, C)
    return pl.pallas_call(
        functools.partial(_maxpool_kernel, ho=Ho, wo=Wo),
        out_shape=jax.ShapeDtypeStruct((N, Ho, Wo, C), x.dtype),
        grid=(N,),
        in_specs=[pl.BlockSpec((4, Hh, Wh, C), lambda n: (n, 0, 0, 0))],
        out_specs=pl.BlockSpec((1, Ho, Wo, C), lambda n: (n, 0, 0, 0)),
        compiler_params=pltpu.CompilerParams(dimension_semantics=("parallel",)),
    )(xe)


@jax.jit
def global_avgpool(x):
    """AdaptiveAvgPool2d(1): bf16 in, f32 reduction/output."""
    N, H, W, C = x.shape
    return pl.pallas_call(
        _avgpool_kernel,
        out_shape=jax.ShapeDtypeStruct((N, C), jnp.float32),
        grid=(N,),
        in_specs=[pl.BlockSpec((1, H * W, C), lambda n: (n, 0, 0))],
        out_specs=pl.BlockSpec((1, C), lambda n: (n, 0)),
        compiler_params=pltpu.CompilerParams(dimension_semantics=("parallel",)),
    )(x.reshape(N, H * W, C))


# --------------------------------------------------------------------- parameter setup
def _conv_bn_params(key, cin, cout, k, w_gain=1.0):
    kw_, kg, kb, km, kv = jax.random.split(key, 5)
    fan_in = cin * k * k
    w = jax.random.normal(kw_, (cout, cin, k, k), jnp.float32) * jnp.sqrt(2.0 / fan_in) * w_gain
    gamma = 1.0 + 0.1 * jax.random.normal(kg, (cout,), jnp.float32)
    beta = 0.1 * jax.random.normal(kb, (cout,), jnp.float32)
    mean = 0.1 * jax.random.normal(km, (cout,), jnp.float32)
    var = 0.5 + jax.random.uniform(kv, (cout,), jnp.float32)
    # eval-mode BN folded into a per-channel scale/bias applied in the matmul epilogue
    s = gamma / jnp.sqrt(var + 1e-5)
    b = beta - mean * s
    # pre-pack the weight once: OIHW -> (k*k*Cin, Cout), pad to the GEMM tile grid, bf16
    K, N = k * k * cin, cout
    tk, tn = _kn_tiles(K, N)
    Kp, Np = _round_up(K, tk), _round_up(N, tn)
    wp = jnp.transpose(w, (2, 3, 1, 0)).reshape(K, N)
    wp = jnp.pad(wp, ((0, Kp - K), (0, Np - N))).astype(jnp.bfloat16)
    return {"w": wp, "sb": jnp.stack([s, b]), "ksize": k}


def init_resnet152_params(key):
    # torchvision resnet152: layers = [3, 8, 36, 3], Bottleneck (expansion 4), stride on conv2.
    # TODO(synk): pretrained=True is replaced by deterministic synthetic weights (no checkpoint IO).
    keys = iter(jax.random.split(key, 512))
    params = {"conv1": _conv_bn_params(next(keys), 3, 64, 7)}
    cfg = [(64, 3, 1), (128, 8, 2), (256, 36, 2), (512, 3, 2)]
    inplanes = 64
    layers = []
    for planes, blocks, stride in cfg:
        layer = []
        for bi in range(blocks):
            s = stride if bi == 0 else 1
            blk = {
                "conv1": _conv_bn_params(next(keys), inplanes, planes, 1),
                "conv2": _conv_bn_params(next(keys), planes, planes, 3),
                # damp the residual branch so 50 randomly-initialized blocks stay finite
                "conv3": _conv_bn_params(next(keys), planes, planes * 4, 1, w_gain=0.2),
                "stride": s,
            }
            if s != 1 or inplanes != planes * 4:
                blk["downsample"] = _conv_bn_params(next(keys), inplanes, planes * 4, 1)
            layer.append(blk)
            inplanes = planes * 4
        layers.append(layer)
    params["layers"] = layers
    return params


# ------------------------------------------------------------------------ forward pass
def bottleneck(x, blk):
    out = conv_bn(x, blk["conv1"], 1, 0, True)
    out = conv_bn(out, blk["conv2"], blk["stride"], 1, True)
    if "downsample" in blk:
        identity = conv_bn(x, blk["downsample"], blk["stride"], 0, False)
    else:
        identity = x
    # conv3 + BN + residual add (f32) + ReLU fused into one matmul epilogue
    return conv_bn(out, blk["conv3"], 1, 0, True, residual=identity)


def resnet_feature_extractor(params, x_nchw):
    """Matches _ResNetFeatureExtractor(avg_size=1).forward: NCHW in, (N, 2048, 1, 1) out."""
    x = jnp.transpose(x_nchw, (0, 2, 3, 1))                       # NCHW -> NHWC
    x = conv_bn(x, params["conv1"], 2, 3, True)                   # conv1 + bn1 + relu (bf16 out)
    x = maxpool_3x3_s2(x)                                         # maxpool 3x3 s2 p1
    for layer in params["layers"]:                                # layer1..layer4
        for blk in layer:
            x = bottleneck(x, blk)
    feat = global_avgpool(x)                                      # AdaptiveAvgPool2d(1), f32
    return feat[:, :, None, None]                                 # (N, 2048, 1, 1) NCHW


if __name__ == "__main__":
    key = jax.random.PRNGKey(0)
    kx, kp = jax.random.split(key)
    # Small input for correctness only (dispatch-bound at this size); benchmark at 224x224.
    x = jax.random.normal(kx, (2, 3, 32, 32), jnp.float32)
    params = init_resnet152_params(kp)

    out = resnet_feature_extractor(params, x)
    out = jax.block_until_ready(out)

    assert out.shape == (2, 2048, 1, 1), out.shape
    assert bool(jnp.all(jnp.isfinite(out)))
    print("KERNEL_OK")
</pallas_src>

<mosaic_0001>
module attributes {stable_mosaic.version = 11 : i64} {
  func.func @_mm_kernel_single_k(%arg0: i32, %arg1: i32, %arg2: i32, %arg3: memref<512x256xbf16, #tpu.memory_space<vmem>>, %arg4: memref<256x64xbf16, #tpu.memory_space<vmem>>, %arg5: memref<2x64xf32, #tpu.memory_space<vmem>>, %arg6: memref<512x64xbf16, #tpu.memory_space<vmem>>) attributes {dimension_semantics = [#tpu.dimension_semantics<parallel>, #tpu.dimension_semantics<parallel>, #tpu.dimension_semantics<arbitrary>], iteration_bounds = array<i64: 1, 1, 1>, scalar_prefetch = 0 : i64, scratch_operands = 0 : i64, tpu.core_type = #tpu.core_type<tc>, window_params = [{transform_indices = @transform_0, window_bounds = array<i64: 512, 256>}, {transform_indices = @transform_1, window_bounds = array<i64: 256, 64>}, {transform_indices = @transform_2, window_bounds = array<i64: 2, 64>}, {transform_indices = @transform_3, window_bounds = array<i64: 512, 64>}]} {
    %c0 = arith.constant 0 : index
    %c0_0 = arith.constant 0 : index
    %0 = vector.load %arg3[%c0, %c0_0] : memref<512x256xbf16, #tpu.memory_space<vmem>>, vector<512x256xbf16>
    %c0_1 = arith.constant 0 : index
    %c0_2 = arith.constant 0 : index
    %1 = vector.load %arg4[%c0_1, %c0_2] : memref<256x64xbf16, #tpu.memory_space<vmem>>, vector<256x64xbf16>
    %cst = arith.constant dense<0.000000e+00> : vector<512x64xf32>
    %2 = tpu.matmul %0, %1, %cst {dimension_numbers = #tpu.dot_dimension_numbers<[1], [0], [0], [1], [0, 0, 1, 1], [], []>} : vector<512x256xbf16>, vector<256x64xbf16>, vector<512x64xf32> -> vector<512x64xf32>
    %c0_3 = arith.constant 0 : index
    %c0_4 = arith.constant 0 : index
    %3 = vector.load %arg5[%c0_3, %c0_4] : memref<2x64xf32, #tpu.memory_space<vmem>>, vector<1x64xf32>
    %4 = vector.broadcast %3 : vector<1x64xf32> to vector<512x64xf32>
    %5 = arith.mulf %2, %4 : vector<512x64xf32>
    %c1 = arith.constant 1 : index
    %c0_5 = arith.constant 0 : index
    %6 = vector.load %arg5[%c1, %c0_5] : memref<2x64xf32, #tpu.memory_space<vmem>>, vector<1x64xf32>
    %7 = vector.broadcast %6 : vector<1x64xf32> to vector<512x64xf32>
    %8 = arith.addf %5, %7 : vector<512x64xf32>
    %cst_6 = arith.constant 0.000000e+00 : f32
    %9 = vector.broadcast %cst_6 : f32 to vector<512x64xf32>
    %10 = arith.maximumf %8, %9 : vector<512x64xf32>
    %11 = arith.truncf %10 : vector<512x64xf32> to vector<512x64xbf16>
    %c0_7 = arith.constant 0 : index
    %c0_8 = arith.constant 0 : index
    %12 = vector.load %arg6[%c0_7, %c0_8] : memref<512x64xbf16, #tpu.memory_space<vmem>>, vector<512x64xbf16>
    tpu.vector_store %arg6[%c0_7, %c0_8], %11 {strides = array<i32>} : memref<512x64xbf16, #tpu.memory_space<vmem>>, vector<512x64xbf16>,
    return
  }
  func.func @transform_0(%arg0: i32, %arg1: i32, %arg2: i32) -> (i32, i32) {
    %c0_i32 = arith.constant 0 : i32
    return %arg1, %arg2 : i32, i32
  }
  func.func @transform_1(%arg0: i32, %arg1: i32, %arg2: i32) -> (i32, i32) {
    %c0_i32 = arith.constant 0 : i32
    return %arg2, %arg0 : i32, i32
  }
  func.func @transform_2(%arg0: i32, %arg1: i32, %arg2: i32) -> (i32, i32) {
    %c0_i32 = arith.constant 0 : i32
    %c0_i32_0 = arith.constant 0 : i32
    return %c0_i32, %arg0 : i32, i32
  }
  func.func @transform_3(%arg0: i32, %arg1: i32, %arg2: i32) -> (i32, i32) {
    %c0_i32 = arith.constant 0 : i32
    return %arg1, %arg0 : i32, i32
  }
}

</mosaic_0001>

<bundles_post_ra>
// kernel: _conv_bn_impl.1
= control target key start
LH: loop header
LB: loop body
LE: loop exit
PB: predicated region body
PF: predicated region fallthrough
CT: control target
= control target key end

     0   :  { %s2327_s0 = inlined_call_operand.vmem [shape: bf16[512,256], index: 0, kind: input, shape index: {}]   ;;  %s2328_s1 = inlined_call_operand.vmem [shape: bf16[256,64], index: 1, kind: input, shape index: {}]   ;;  %s2329_s2 = inlined_call_operand.vmem [shape: f32[2,64], index: 2, kind: input, shape index: {}]   ;;  %s2330_s3 = inlined_call_operand.hbm [shape: bf16[512,64], index: 3, kind: output, shape index: {}]  }
   0x1   :  { %v1599_v0 = vld [vmem:[%s2328_s1 + $0x38] sm:$0xff]  ;;  %v1598_v2 = vld [vmem:[%s2328_s1 + $0x30] sm:$0xff]  ;;  %v1597_v4 = vld [vmem:[%s2328_s1 + $0x28] sm:$0xff] }
   0x2   :  { %v1607_v1 = vld [vmem:[%s2328_s1 + $0x78] sm:$0xff]  ;;  %527 = vmatpush.bf16.msra.mxu0 %v1599_v0  ;;  %1608 = vmatpush.bf16.msra.mxu2 %v1599_v0  ;;  %v1606_v3 = vld [vmem:[%s2328_s1 + $0x70] sm:$0xff]  ;;  %v1605_v5 = vld [vmem:[%s2328_s1 + $0x68] sm:$0xff] }
   0x3   :  { %696 = vmatpush.bf16.msra.mxu1 %v1607_v1  ;;  %1616 = vmatpush.bf16.msra.mxu3 %v1607_v1 }
   0x6   :  { %528 = vmatpush.bf16.msra.mxu0 %v1598_v2  ;;  %1609 = vmatpush.bf16.msra.mxu2 %v1598_v2 }
   0x7   :  { %697 = vmatpush.bf16.msra.mxu1 %v1606_v3  ;;  %1617 = vmatpush.bf16.msra.mxu3 %v1606_v3 }
   0x8   :  { %8 = vsyncpa [#allocation3], 0  ;;  %v1596_v6 = vld [vmem:[%s2328_s1 + $0x20] sm:$0xff]  ;;  %v1595_v8 = vld [vmem:[%s2328_s1 + $0x18] sm:$0xff]  ;;  %vm1125_vm0 = vcmask 519168   ;;  %s1196_s30 = sshll.u32 %s2330_s3, 4  ;;  %s1197_s30 = int_to_ptr.hbm [resolvable:$true] %s1196_s30 }
   0x9   :  { %v1604_v7 = vld [vmem:[%s2328_s1 + $0x60] sm:$0xff]  ;;  %v1603_v9 = vld [vmem:[%s2328_s1 + $0x58] sm:$0xff]  ;;  %v1594_v10 = vld [vmem:[%s2328_s1 + $0x10] sm:$0xff]  ;;  %s1658_s4 = smov 64   ;;  %s1659_s5 = smov 4  }
   0xa   :  { %529 = vmatpush.bf16.msra.mxu0 %v1597_v4  ;;  %1610 = vmatpush.bf16.msra.mxu2 %v1597_v4  ;;  %v1602_v11 = vld [vmem:[%s2328_s1 + $0x50] sm:$0xff]  ;;  %v1593_v12 = vld [vmem:[%s2328_s1 + $0x8] sm:$0xff]  ;;  %v1592_v14 = vld [vmem:[%s2328_s1] sm:$0xff] }
   0xb   :  { %698 = vmatpush.bf16.msra.mxu1 %v1605_v5  ;;  %1618 = vmatpush.bf16.msra.mxu3 %v1605_v5  ;;  %v1601_v13 = vld [vmem:[%s2328_s1 + $0x48] sm:$0xff]  ;;  %v1600_v15 = vld [vmem:[%s2328_s1 + $0x40] sm:$0xff]  ;;  %v1218_v28 = vld [vmem:[%s2327_s0 + $0x10] sm:$0xf] }
   0xc   :  { %v1210_v16 = vld [vmem:[%s2327_s0] sm:$0xf]  ;;  %v1529_v17 = vld [vmem:[%s2327_s0 + $0x4] sm:$0xf0]  ;;  %v1528_v20 = vld [vmem:[%s2327_s0 + $0x4] sm:$0xf] }
   0xd   :  { %v1338_v18 = vld [vmem:[%s2327_s0 + $0x100] sm:$0xf]  ;;  %v1561_v19 = vld [vmem:[%s2327_s0 + $0x104] sm:$0xf0]  ;;  %v1212_v21 = vld [vmem:[%s2327_s0 + $0x8] sm:$0xf0]  ;;  %v1211_v24 = vor.u32 %v1529_v17, %v1210_v16 }
   0xe   :  { %530 = vmatpush.bf16.msra.mxu0 %v1596_v6  ;;  %1611 = vmatpush.bf16.msra.mxu2 %v1596_v6  ;;  %v1560_v22 = vld [vmem:[%s2327_s0 + $0x104] sm:$0xf]  ;;  %v1340_v23 = vld [vmem:[%s2327_s0 + $0x108] sm:$0xf0]  ;;  %v1339_v25 = vor.u32 %v1561_v19, %v1338_v18  ;;  %v1215_v26 = vor.u32 %v1528_v20, %v1212_v21  ;;  %v1531_v29 = vld [vmem:[%s2327_s0 + $0x14] sm:$0xf0] }
   0xf   :  { %699 = vmatpush.bf16.msra.mxu1 %v1604_v7  ;;  %1619 = vmatpush.bf16.msra.mxu3 %v1604_v7  ;;  %v1343_v27 = vor.u32 %v1560_v22, %v1340_v23  ;;  %v1346_v30 = vld [vmem:[%s2327_s0 + $0x110] sm:$0xf]  ;;  %v1563_v31 = vld [vmem:[%s2327_s0 + $0x114] sm:$0xf0]  ;;  %v1530_v32 = vld [vmem:[%s2327_s0 + $0x14] sm:$0xf]  ;;  %v1219_v36 = vor.u32 %v1531_v29, %v1218_v28 }
  0x10   :  { %v1220_v33 = vld [vmem:[%s2327_s0 + $0x18] sm:$0xf0]  ;;  %v1562_v34 = vld [vmem:[%s2327_s0 + $0x114] sm:$0xf]  ;;  %v1347_v37 = vor.u32 %v1563_v31, %v1346_v30  ;;  %v1226_v40 = vld [vmem:[%s2327_s0 + $0x20] sm:$0xf] }
  0x11   :  { %v1348_v35 = vld [vmem:[%s2327_s0 + $0x118] sm:$0xf0]  ;;  %v1223_v38 = vor.u32 %v1530_v32, %v1220_v33  ;;  %v1533_v41 = vld [vmem:[%s2327_s0 + $0x24] sm:$0xf0]  ;;  %v1354_v42 = vld [vmem:[%s2327_s0 + $0x120] sm:$0xf] }
  0x12   :  { %531 = vmatpush.bf16.msra.mxu0 %v1595_v8  ;;  %1612 = vmatpush.bf16.msra.mxu2 %v1595_v8  ;;  %v1351_v39 = vor.u32 %v1562_v34, %v1348_v35  ;;  %v1565_v43 = vld [vmem:[%s2327_s0 + $0x124] sm:$0xf0]  ;;  %v1532_v44 = vld [vmem:[%s2327_s0 + $0x24] sm:$0xf]  ;;  %v1228_v45 = vld [vmem:[%s2327_s0 + $0x28] sm:$0xf0]  ;;  %v1227_v48 = vor.u32 %v1533_v41, %v1226_v40 }
  0x13   :  { %700 = vmatpush.bf16.msra.mxu1 %v1603_v9  ;;  %1620 = vmatpush.bf16.msra.mxu3 %v1603_v9  ;;  %v1564_v46 = vld [vmem:[%s2327_s0 + $0x124] sm:$0xf]  ;;  %v1356_v47 = vld [vmem:[%s2327_s0 + $0x128] sm:$0xf0]  ;;  %v1355_v49 = vor.u32 %v1565_v43, %v1354_v42  ;;  %v1231_v50 = vor.u32 %v1532_v44, %v1228_v45  ;;  %v1234_v52 = vld [vmem:[%s2327_s0 + $0x30] sm:$0xf] }
  0x14   :  { %v1359_v51 = vor.u32 %v1564_v46, %v1356_v47  ;;  %v1535_v53 = vld [vmem:[%s2327_s0 + $0x34] sm:$0xf0]  ;;  %v1362_v54 = vld [vmem:[%s2327_s0 + $0x130] sm:$0xf]  ;;  %v1534_v56 = vld [vmem:[%s2327_s0 + $0x34] sm:$0xf] }
  0x15   :  { %v1567_v55 = vld [vmem:[%s2327_s0 + $0x134] sm:$0xf0]  ;;  %v1236_v57 = vld [vmem:[%s2327_s0 + $0x38] sm:$0xf0]  ;;  %v1566_v58 = vld [vmem:[%s2327_s0 + $0x134] sm:$0xf]  ;;  %v1235_v60 = vor.u32 %v1535_v53, %v1234_v52 }
  0x16   :  { %532 = vmatpush.bf16.msra.mxu0 %v1594_v10  ;;  %1613 = vmatpush.bf16.msra.mxu2 %v1594_v10  ;;  %v1364_v59 = vld [vmem:[%s2327_s0 + $0x138] sm:$0xf0]  ;;  %v1363_v61 = vor.u32 %v1567_v55, %v1362_v54  ;;  %v1239_v62 = vor.u32 %v1534_v56, %v1236_v57  ;;  %v1242_v0 = vld [vmem:[%s2327_s0 + $0x40] sm:$0xf]  ;;  %v1537_v1 = vld [vmem:[%s2327_s0 + $0x44] sm:$0xf0] }
  0x17   :  { %701 = vmatpush.bf16.msra.mxu1 %v1602_v11  ;;  %1621 = vmatpush.bf16.msra.mxu3 %v1602_v11  ;;  %v1367_v63 = vor.u32 %v1566_v58, %v1364_v59  ;;  %v1370_v2 = vld [vmem:[%s2327_s0 + $0x140] sm:$0xf]  ;;  %v1569_v3 = vld [vmem:[%s2327_s0 + $0x144] sm:$0xf0]  ;;  %v1536_v4 = vld [vmem:[%s2327_s0 + $0x44] sm:$0xf]  ;;  %v1243_v8 = vor.u32 %v1537_v1, %v1242_v0 }
  0x18   :  { %v1244_v5 = vld [vmem:[%s2327_s0 + $0x48] sm:$0xf0]  ;;  %v1568_v6 = vld [vmem:[%s2327_s0 + $0x144] sm:$0xf]  ;;  %v1371_v9 = vor.u32 %v1569_v3, %v1370_v2  ;;  %v1538_v16 = vld [vmem:[%s2327_s0 + $0x54] sm:$0xf] }
  0x19   :  { %v1372_v7 = vld [vmem:[%s2327_s0 + $0x148] sm:$0xf0]  ;;  %v1247_v10 = vor.u32 %v1536_v4, %v1244_v5  ;;  %v1252_v17 = vld [vmem:[%s2327_s0 + $0x58] sm:$0xf0]  ;;  %v1570_v18 = vld [vmem:[%s2327_s0 + $0x154] sm:$0xf] }
  0x1a   :  { %533 = vmatpush.bf16.msra.mxu0 %v1593_v12  ;;  %1614 = vmatpush.bf16.msra.mxu2 %v1593_v12  ;;  %v1375_v11 = vor.u32 %v1568_v6, %v1372_v7  ;;  %v1250_v12 = vld [vmem:[%s2327_s0 + $0x50] sm:$0xf]  ;;  %v1380_v19 = vld [vmem:[%s2327_s0 + $0x158] sm:$0xf0]  ;;  %v1255_v22 = vor.u32 %v1538_v16, %v1252_v17  ;;  %v1540_v28 = vld [vmem:[%s2327_s0 + $0x64] sm:$0xf] }
  0x1b   :  { %702 = vmatpush.bf16.msra.mxu1 %v1601_v13  ;;  %1622 = vmatpush.bf16.msra.mxu3 %v1601_v13  ;;  %v1539_v13 = vld [vmem:[%s2327_s0 + $0x54] sm:$0xf0]  ;;  %v1383_v23 = vor.u32 %v1570_v18, %v1380_v19  ;;  %v1260_v29 = vld [vmem:[%s2327_s0 + $0x68] sm:$0xf0]  ;;  %v1572_v30 = vld [vmem:[%s2327_s0 + $0x164] sm:$0xf] }
  0x1c   :  { %v1251_v20 = vor.u32 %v1539_v13, %v1250_v12  ;;  %v1388_v31 = vld [vmem:[%s2327_s0 + $0x168] sm:$0xf0]  ;;  %v1263_v34 = vor.u32 %v1540_v28, %v1260_v29  ;;  %v1542_v40 = vld [vmem:[%s2327_s0 + $0x74] sm:$0xf]  ;;  %v1268_v41 = vld [vmem:[%s2327_s0 + $0x78] sm:$0xf0] }
  0x1d   :  { %v1391_v35 = vor.u32 %v1572_v30, %v1388_v31  ;;  %v1574_v42 = vld [vmem:[%s2327_s0 + $0x174] sm:$0xf]  ;;  %v1396_v43 = vld [vmem:[%s2327_s0 + $0x178] sm:$0xf0]  ;;  %v1271_v46 = vor.u32 %v1542_v40, %v1268_v41  ;;  %v1544_v52 = vld [vmem:[%s2327_s0 + $0x84] sm:$0xf] }
  0x1e   :  { %534 = vmatpush.bf16.msra.mxu0 %v1592_v14  ;;  %1615 = vmatpush.bf16.msra.mxu2 %v1592_v14  ;;  %v1378_v14 = vld [vmem:[%s2327_s0 + $0x150] sm:$0xf]  ;;  %v1399_v47 = vor.u32 %v1574_v42, %v1396_v43  ;;  %v1276_v53 = vld [vmem:[%s2327_s0 + $0x88] sm:$0xf0]  ;;  %v1576_v54 = vld [vmem:[%s2327_s0 + $0x184] sm:$0xf] }
  0x1f   :  { %703 = vmatpush.bf16.msra.mxu1 %v1600_v15  ;;  %1623 = vmatpush.bf16.msra.mxu3 %v1600_v15  ;;  %v1571_v15 = vld [vmem:[%s2327_s0 + $0x154] sm:$0xf0]  ;;  %v1404_v55 = vld [vmem:[%s2327_s0 + $0x188] sm:$0xf0]  ;;  %v1947_v59 = vld [vmem:[%s2329_s2] ss:$0 sm:$0xff] }
  0x20   :  { %v1379_v21 = vor.u32 %v1571_v15, %v1378_v14  ;;  %v1952_v0 = vld [vmem:[%s2329_s2 + $0x1] ss:$0 sm:$0xff]  ;;  %v1282_v12 = vld [vmem:[%s2327_s0 + $0x90] sm:$0xf]  ;;  %v1547_v13 = vld [vmem:[%s2327_s0 + $0x94] sm:$0xf0] }
  0x21   :  { %535 = vmatmul.bf16.vlgmr.msra.gmra.mxu0 %v1211_v24  ;;  %615 = vmatmul.bf16.vlgmr.msra.gmra.mxu2 %v1339_v25  ;;  %v1258_v24 = vld [vmem:[%s2327_s0 + $0x60] sm:$0xf]  ;;  %v1541_v25 = vld [vmem:[%s2327_s0 + $0x64] sm:$0xf0]  ;;  %v1410_v14 = vld [vmem:[%s2327_s0 + $0x190] sm:$0xf] }
  0x22   :  { %704 = vmatmul.bf16.vlgmr.msra.gmra.mxu1 %v1215_v26  ;;  %784 = vmatmul.bf16.vlgmr.msra.gmra.mxu3 %v1343_v27  ;;  %v1386_v26 = vld [vmem:[%s2327_s0 + $0x160] sm:$0xf]  ;;  %v1573_v27 = vld [vmem:[%s2327_s0 + $0x164] sm:$0xf0]  ;;  %v1259_v32 = vor.u32 %v1541_v25, %v1258_v24  ;;  %v1579_v15 = vld [vmem:[%s2327_s0 + $0x194] sm:$0xf0] }
  0x23   :  { %v1387_v33 = vor.u32 %v1573_v27, %v1386_v26  ;;  %v1546_v18 = vld [vmem:[%s2327_s0 + $0x94] sm:$0xf]  ;;  %v1284_v19 = vld [vmem:[%s2327_s0 + $0x98] sm:$0xf0]  ;;  %v1283_v26 = vor.u32 %v1547_v13, %v1282_v12  ;;  %v1411_v27 = vor.u32 %v1579_v15, %v1410_v14 }
  0x24   :  { %v1287_v28 = vor.u32 %v1546_v18, %v1284_v19 }
  0x31   :  { %540 = vmatmul.bf16.gmra.mxu0 %v1219_v36  ;;  %620 = vmatmul.bf16.gmra.mxu2 %v1347_v37  ;;  %v1266_v36 = vld [vmem:[%s2327_s0 + $0x70] sm:$0xf]  ;;  %v1543_v37 = vld [vmem:[%s2327_s0 + $0x74] sm:$0xf0] }
  0x32   :  { %709 = vmatmul.bf16.gmra.mxu1 %v1223_v38  ;;  %789 = vmatmul.bf16.gmra.mxu3 %v1351_v39  ;;  %v1394_v38 = vld [vmem:[%s2327_s0 + $0x170] sm:$0xf]  ;;  %v1575_v39 = vld [vmem:[%s2327_s0 + $0x174] sm:$0xf0]  ;;  %v1267_v44 = vor.u32 %v1543_v37, %v1266_v36 }
  0x33   :  { %v1395_v45 = vor.u32 %v1575_v39, %v1394_v38 }
  0x41   :  { %545 = vmatmul.bf16.gmra.mxu0 %v1227_v48  ;;  %625 = vmatmul.bf16.gmra.mxu2 %v1355_v49  ;;  %v1274_v48 = vld [vmem:[%s2327_s0 + $0x80] sm:$0xf]  ;;  %v1545_v49 = vld [vmem:[%s2327_s0 + $0x84] sm:$0xf0] }
  0x42   :  { %714 = vmatmul.bf16.gmra.mxu1 %v1231_v50  ;;  %794 = vmatmul.bf16.gmra.mxu3 %v1359_v51  ;;  %v1402_v50 = vld [vmem:[%s2327_s0 + $0x180] sm:$0xf]  ;;  %v1577_v51 = vld [vmem:[%s2327_s0 + $0x184] sm:$0xf0]  ;;  %v1275_v56 = vor.u32 %v1545_v49, %v1274_v48 }
  0x43   :  { %v1403_v57 = vor.u32 %v1577_v51, %v1402_v50 }
  0x51   :  { %550 = vmatmul.bf16.gmra.mxu0 %v1235_v60  ;;  %630 = vmatmul.bf16.gmra.mxu2 %v1363_v61  ;;  %v1279_v60 = vor.u32 %v1544_v52, %v1276_v53  ;;  %v1407_v61 = vor.u32 %v1576_v54, %v1404_v55  ;;  %v1290_v52 = vld [vmem:[%s2327_s0 + $0xa0] sm:$0xf]  ;;  %v1549_v53 = vld [vmem:[%s2327_s0 + $0xa4] sm:$0xf0] }
  0x52   :  { %719 = vmatmul.bf16.gmra.mxu1 %v1239_v62  ;;  %799 = vmatmul.bf16.gmra.mxu3 %v1367_v63  ;;  %v1418_v54 = vld [vmem:[%s2327_s0 + $0x1a0] sm:$0xf]  ;;  %v1581_v55 = vld [vmem:[%s2327_s0 + $0x1a4] sm:$0xf0] }
  0x61   :  { %555 = vmatmul.bf16.gmra.mxu0 %v1243_v8  ;;  %635 = vmatmul.bf16.gmra.mxu2 %v1371_v9 }
  0x62   :  { %724 = vmatmul.bf16.gmra.mxu1 %v1247_v10  ;;  %804 = vmatmul.bf16.gmra.mxu3 %v1375_v11 }
  0x71   :  { %560 = vmatmul.bf16.gmra.mxu0 %v1251_v20  ;;  %640 = vmatmul.bf16.gmra.mxu2 %v1379_v21  ;;  %v1578_v20 = vld [vmem:[%s2327_s0 + $0x194] sm:$0xf]  ;;  %v1412_v21 = vld [vmem:[%s2327_s0 + $0x198] sm:$0xf0] }
  0x72   :  { %729 = vmatmul.bf16.gmra.mxu1 %v1255_v22  ;;  %809 = vmatmul.bf16.gmra.mxu3 %v1383_v23 }
  0x81   :  { %565 = vmatmul.bf16.gmra.mxu0 %v1259_v32  ;;  %645 = vmatmul.bf16.gmra.mxu2 %v1387_v33  ;;  %v1415_v33 = vor.u32 %v1578_v20, %v1412_v21 }
  0x82   :  { %734 = vmatmul.bf16.gmra.mxu1 %v1263_v34  ;;  %814 = vmatmul.bf16.gmra.mxu3 %v1391_v35 }
  0x91   :  { %570 = vmatmul.bf16.gmra.mxu0 %v1267_v44  ;;  %650 = vmatmul.bf16.gmra.mxu2 %v1395_v45 }
  0x92   :  { %739 = vmatmul.bf16.gmra.mxu1 %v1271_v46  ;;  %819 = vmatmul.bf16.gmra.mxu3 %v1399_v47 }
  0x9e   :  { %v536_v58 = vpop.f32.mrf.mxu0 }
  0x9f   :  { %v705_v62 = vpop.f32.mrf.mxu1 }
  0xa0   :  { %v706_v63 = vadd.f32 %v705_v62, %v536_v58  ;;  %v1548_v58 = vld [vmem:[%s2327_s0 + $0xa4] sm:$0xf]  ;;  %v1420_v62 = vld [vmem:[%s2327_s0 + $0x1a8] sm:$0xf0] }
  0xa1   :  { %575 = vmatmul.bf16.gmra.mxu0 %v1275_v56  ;;  %655 = vmatmul.bf16.gmra.mxu2 %v1403_v57 }
  0xa2   :  { %v867_v1 = vmul.f32 %v1947_v59, %v706_v63  ;;  %744 = vmatmul.bf16.gmra.mxu1 %v1279_v60  ;;  %824 = vmatmul.bf16.gmra.mxu3 %v1407_v61  ;;  %v1292_v60 = vld [vmem:[%s2327_s0 + $0xa8] sm:$0xf0]  ;;  %v1580_v61 = vld [vmem:[%s2327_s0 + $0x1a4] sm:$0xf] }
  0xa4   :  { %v933_v2 = vadd.f32 %v1952_v0, %v867_v1  ;;  %v616_v3 = vpop.f32.mrf.mxu2 }
  0xa5   :  { %v785_v4 = vpop.f32.mrf.mxu3 }
  0xa6   :  { %v997_v5 = vmax.f32 %v933_v2, 0.0  ;;  %v786_v6 = vadd.f32 %v785_v4, %v616_v3  ;;  %v538_v7 = vpop.f32.mrf.mxu0  ;;  %v1291_v4 = vor.u32 %v1549_v53, %v1290_v52 }
  0xa7   :  { %v707_v8 = vpop.f32.mrf.mxu1 }
  0xa8   :  { %v1061_v9 = vpack.c.bf16 %v997_v5, %v997_v5  ;;  %v899_v10 = vmul.f32 %v1947_v59, %v786_v6  ;;  %v708_v11 = vadd.f32 %v707_v8, %v538_v7  ;;  %v1419_v5 = vor.u32 %v1581_v55, %v1418_v54 }
  0xa9   :  { %v1295_v6 = vor.u32 %v1548_v58, %v1292_v60 }
  0xaa   :  { %1126 = vst.msk [vmem:[#allocation2] sm:$0xf] %vm1125_vm0, %v1061_v9  ;;  %v965_v16 = vadd.f32 %v1952_v0, %v899_v10  ;;  %v868_v17 = vmul.f32 %v1947_v59, %v708_v11  ;;  %v1423_v11 = vor.u32 %v1580_v61, %v1420_v62 }
  0xac   :  { %v1029_v22 = vmax.f32 %v965_v16, 0.0  ;;  %v934_v23 = vadd.f32 %v1952_v0, %v868_v17  ;;  %v618_v24 = vpop.f32.mrf.mxu2 }
  0xad   :  { %v787_v25 = vpop.f32.mrf.mxu3 }
  0xae   :  { %v1093_v29 = vpack.c.bf16 %v1029_v22, %v1029_v22  ;;  %v998_v30 = vmax.f32 %v934_v23, 0.0  ;;  %v788_v31 = vadd.f32 %v787_v25, %v618_v24  ;;  %v541_v32 = vpop.f32.mrf.mxu0 }
  0xaf   :  { %v710_v34 = vpop.f32.mrf.mxu1 }
  0xb0   :  { %1158 = vst.msk [vmem:[#allocation2 + $0x80] sm:$0xf] %vm1125_vm0, %v1093_v29  ;;  %v1062_v35 = vpack.c.bf16 %v998_v30, %v998_v30  ;;  %v900_v36 = vmul.f32 %v1947_v59, %v788_v31  ;;  %v711_v37 = vadd.f32 %v710_v34, %v541_v32  ;;  %v1298_v30 = vld [vmem:[%s2327_s0 + $0xb0] sm:$0xf]  ;;  %v1551_v31 = vld [vmem:[%s2327_s0 + $0xb4] sm:$0xf0] }
  0xb1   :  { %580 = vmatmul.bf16.gmra.mxu0 %v1283_v26  ;;  %660 = vmatmul.bf16.gmra.mxu2 %v1411_v27  ;;  %v1426_v32 = vld [vmem:[%s2327_s0 + $0x1b0] sm:$0xf] }
  0xb2   :  { %1127 = vst.msk [vmem:[#allocation2 + $0x4] sm:$0xf] %vm1125_vm0, %v1062_v35  ;;  %v966_v38 = vadd.f32 %v1952_v0, %v900_v36  ;;  %v869_v39 = vmul.f32 %v1947_v59, %v711_v37  ;;  %749 = vmatmul.bf16.gmra.mxu1 %v1287_v28  ;;  %829 = vmatmul.bf16.gmra.mxu3 %v1415_v33  ;;  %v1583_v33 = vld [vmem:[%s2327_s0 + $0x1b4] sm:$0xf0]  ;;  %v1550_v36 = vld [vmem:[%s2327_s0 + $0xb4] sm:$0xf] }
  0xb3   :  { %v1300_v37 = vld [vmem:[%s2327_s0 + $0xb8] sm:$0xf0] }
  0xb4   :  { %v1030_v40 = vmax.f32 %v966_v38, 0.0  ;;  %v935_v41 = vadd.f32 %v1952_v0, %v869_v39  ;;  %v621_v42 = vpop.f32.mrf.mxu2  ;;  %v1582_v38 = vld [vmem:[%s2327_s0 + $0x1b4] sm:$0xf]  ;;  %v1428_v39 = vld [vmem:[%s2327_s0 + $0x1b8] sm:$0xf0] }
  0xb5   :  { %v790_v43 = vpop.f32.mrf.mxu3 }
  0xb6   :  { %v1094_v44 = vpack.c.bf16 %v1030_v40, %v1030_v40  ;;  %v999_v45 = vmax.f32 %v935_v41, 0.0  ;;  %v791_v46 = vadd.f32 %v790_v43, %v621_v42  ;;  %v543_v47 = vpop.f32.mrf.mxu0 }
  0xb7   :  { %v712_v48 = vpop.f32.mrf.mxu1 }
  0xb8   :  { %1159 = vst.msk [vmem:[#allocation2 + $0x84] sm:$0xf] %vm1125_vm0, %v1094_v44  ;;  %v1063_v49 = vpack.c.bf16 %v999_v45, %v999_v45  ;;  %v901_v50 = vmul.f32 %v1947_v59, %v791_v46  ;;  %v713_v51 = vadd.f32 %v712_v48, %v543_v47  ;;  %v1299_v44 = vor.u32 %v1551_v31, %v1298_v30 }
  0xb9   :  { %v1427_v45 = vor.u32 %v1583_v33, %v1426_v32  ;;  %v1303_v46 = vor.u32 %v1550_v36, %v1300_v37 }
  0xba   :  { %1128 = vst.msk [vmem:[#allocation2 + $0x8] sm:$0xf] %vm1125_vm0, %v1063_v49  ;;  %v967_v56 = vadd.f32 %v1952_v0, %v901_v50  ;;  %v870_v57 = vmul.f32 %v1947_v59, %v713_v51  ;;  %v1431_v51 = vor.u32 %v1582_v38, %v1428_v39 }
  0xbc   :  { %v1031_v63 = vmax.f32 %v967_v56, 0.0  ;;  %v936_v1 = vadd.f32 %v1952_v0, %v870_v57  ;;  %v623_v2 = vpop.f32.mrf.mxu2 }
  0xbd   :  { %v792_v3 = vpop.f32.mrf.mxu3 }
  0xbe   :  { %v1095_v7 = vpack.c.bf16 %v1031_v63, %v1031_v63  ;;  %v1000_v8 = vmax.f32 %v936_v1, 0.0  ;;  %v793_v9 = vadd.f32 %v792_v3, %v623_v2  ;;  %v546_v10 = vpop.f32.mrf.mxu0 }
  0xbf   :  { %v715_v12 = vpop.f32.mrf.mxu1 }
  0xc0   :  { %1160 = vst.msk [vmem:[#allocation2 + $0x88] sm:$0xf] %vm1125_vm0, %v1095_v7  ;;  %v1064_v13 = vpack.c.bf16 %v1000_v8, %v1000_v8  ;;  %v902_v14 = vmul.f32 %v1947_v59, %v793_v9  ;;  %v716_v15 = vadd.f32 %v715_v12, %v546_v10  ;;  %v1306_v8 = vld [vmem:[%s2327_s0 + $0xc0] sm:$0xf]  ;;  %v1553_v9 = vld [vmem:[%s2327_s0 + $0xc4] sm:$0xf0] }
  0xc1   :  { %585 = vmatmul.bf16.gmra.mxu0 %v1291_v4  ;;  %665 = vmatmul.bf16.gmra.mxu2 %v1419_v5  ;;  %v1434_v10 = vld [vmem:[%s2327_s0 + $0x1c0] sm:$0xf] }
  0xc2   :  { %1129 = vst.msk [vmem:[#allocation2 + $0xc] sm:$0xf] %vm1125_vm0, %v1064_v13  ;;  %v968_v16 = vadd.f32 %v1952_v0, %v902_v14  ;;  %v871_v17 = vmul.f32 %v1947_v59, %v716_v15  ;;  %754 = vmatmul.bf16.gmra.mxu1 %v1295_v6  ;;  %834 = vmatmul.bf16.gmra.mxu3 %v1423_v11  ;;  %v1585_v11 = vld [vmem:[%s2327_s0 + $0x1c4] sm:$0xf0]  ;;  %v1552_v14 = vld [vmem:[%s2327_s0 + $0xc4] sm:$0xf] }
  0xc3   :  { %v1308_v15 = vld [vmem:[%s2327_s0 + $0xc8] sm:$0xf0] }
  0xc4   :  { %v1032_v18 = vmax.f32 %v968_v16, 0.0  ;;  %v937_v19 = vadd.f32 %v1952_v0, %v871_v17  ;;  %v626_v20 = vpop.f32.mrf.mxu2  ;;  %v1584_v16 = vld [vmem:[%s2327_s0 + $0x1c4] sm:$0xf]  ;;  %v1436_v17 = vld [vmem:[%s2327_s0 + $0x1c8] sm:$0xf0] }
  0xc5   :  { %v795_v21 = vpop.f32.mrf.mxu3 }
  0xc6   :  { %v1096_v22 = vpack.c.bf16 %v1032_v18, %v1032_v18  ;;  %v1001_v23 = vmax.f32 %v937_v19, 0.0  ;;  %v796_v24 = vadd.f32 %v795_v21, %v626_v20  ;;  %v548_v25 = vpop.f32.mrf.mxu0 }
  0xc7   :  { %v717_v26 = vpop.f32.mrf.mxu1 }
  0xc8   :  { %1161 = vst.msk [vmem:[#allocation2 + $0x8c] sm:$0xf] %vm1125_vm0, %v1096_v22  ;;  %v1065_v27 = vpack.c.bf16 %v1001_v23, %v1001_v23  ;;  %v903_v28 = vmul.f32 %v1947_v59, %v796_v24  ;;  %v718_v29 = vadd.f32 %v717_v26, %v548_v25  ;;  %v1307_v22 = vor.u32 %v1553_v9, %v1306_v8 }
  0xc9   :  { %v1435_v23 = vor.u32 %v1585_v11, %v1434_v10  ;;  %v1311_v24 = vor.u32 %v1552_v14, %v1308_v15 }
  0xca   :  { %1130 = vst.msk [vmem:[#allocation2 + $0x10] sm:$0xf] %vm1125_vm0, %v1065_v27  ;;  %v969_v34 = vadd.f32 %v1952_v0, %v903_v28  ;;  %v872_v35 = vmul.f32 %v1947_v59, %v718_v29  ;;  %v1439_v29 = vor.u32 %v1584_v16, %v1436_v17 }
  0xcc   :  { %v1033_v40 = vmax.f32 %v969_v34, 0.0  ;;  %v938_v41 = vadd.f32 %v1952_v0, %v872_v35  ;;  %v628_v42 = vpop.f32.mrf.mxu2 }
  0xcd   :  { %v797_v43 = vpop.f32.mrf.mxu3 }
  0xce   :  { %v1097_v47 = vpack.c.bf16 %v1033_v40, %v1033_v40  ;;  %v1002_v48 = vmax.f32 %v938_v41, 0.0  ;;  %v798_v49 = vadd.f32 %v797_v43, %v628_v42  ;;  %v551_v50 = vpop.f32.mrf.mxu0 }
  0xcf   :  { %v720_v52 = vpop.f32.mrf.mxu1 }
  0xd0   :  { %1162 = vst.msk [vmem:[#allocation2 + $0x90] sm:$0xf] %vm1125_vm0, %v1097_v47  ;;  %v1066_v53 = vpack.c.bf16 %v1002_v48, %v1002_v48  ;;  %v904_v54 = vmul.f32 %v1947_v59, %v798_v49  ;;  %v721_v55 = vadd.f32 %v720_v52, %v551_v50  ;;  %v1314_v48 = vld [vmem:[%s2327_s0 + $0xd0] sm:$0xf]  ;;  %v1555_v49 = vld [vmem:[%s2327_s0 + $0xd4] sm:$0xf0] }
  0xd1   :  { %590 = vmatmul.bf16.gmra.mxu0 %v1299_v44  ;;  %670 = vmatmul.bf16.gmra.mxu2 %v1427_v45  ;;  %v1442_v50 = vld [vmem:[%s2327_s0 + $0x1d0] sm:$0xf] }
  0xd2   :  { %1131 = vst.msk [vmem:[#allocation2 + $0x14] sm:$0xf] %vm1125_vm0, %v1066_v53  ;;  %v970_v56 = vadd.f32 %v1952_v0, %v904_v54  ;;  %v873_v57 = vmul.f32 %v1947_v59, %v721_v55  ;;  %759 = vmatmul.bf16.gmra.mxu1 %v1303_v46  ;;  %839 = vmatmul.bf16.gmra.mxu3 %v1431_v51  ;;  %v1587_v51 = vld [vmem:[%s2327_s0 + $0x1d4] sm:$0xf0]  ;;  %v1554_v54 = vld [vmem:[%s2327_s0 + $0xd4] sm:$0xf] }
  0xd3   :  { %v1316_v55 = vld [vmem:[%s2327_s0 + $0xd8] sm:$0xf0] }
  0xd4   :  { %v1034_v58 = vmax.f32 %v970_v56, 0.0  ;;  %v939_v60 = vadd.f32 %v1952_v0, %v873_v57  ;;  %v631_v61 = vpop.f32.mrf.mxu2  ;;  %v1586_v56 = vld [vmem:[%s2327_s0 + $0x1d4] sm:$0xf]  ;;  %v1444_v57 = vld [vmem:[%s2327_s0 + $0x1d8] sm:$0xf0] }
  0xd5   :  { %v800_v62 = vpop.f32.mrf.mxu3 }
  0xd6   :  { %v1098_v63 = vpack.c.bf16 %v1034_v58, %v1034_v58  ;;  %v1003_v1 = vmax.f32 %v939_v60, 0.0  ;;  %v801_v2 = vadd.f32 %v800_v62, %v631_v61  ;;  %v553_v3 = vpop.f32.mrf.mxu0 }
  0xd7   :  { %v722_v4 = vpop.f32.mrf.mxu1 }
  0xd8   :  { %1163 = vst.msk [vmem:[#allocation2 + $0x94] sm:$0xf] %vm1125_vm0, %v1098_v63  ;;  %v1067_v5 = vpack.c.bf16 %v1003_v1, %v1003_v1  ;;  %v905_v6 = vmul.f32 %v1947_v59, %v801_v2  ;;  %v723_v7 = vadd.f32 %v722_v4, %v553_v3  ;;  %v1315_v63 = vor.u32 %v1555_v49, %v1314_v48 }
  0xd9   :  { %v1443_v1 = vor.u32 %v1587_v51, %v1442_v50  ;;  %v1319_v2 = vor.u32 %v1554_v54, %v1316_v55 }
  0xda   :  { %1132 = vst.msk [vmem:[#allocation2 + $0x18] sm:$0xf] %vm1125_vm0, %v1067_v5  ;;  %v971_v12 = vadd.f32 %v1952_v0, %v905_v6  ;;  %v874_v13 = vmul.f32 %v1947_v59, %v723_v7  ;;  %v1447_v7 = vor.u32 %v1586_v56, %v1444_v57 }
  0xdc   :  { %v1035_v18 = vmax.f32 %v971_v12, 0.0  ;;  %v940_v19 = vadd.f32 %v1952_v0, %v874_v13  ;;  %v633_v20 = vpop.f32.mrf.mxu2 }
  0xdd   :  { %v802_v21 = vpop.f32.mrf.mxu3 }
  0xde   :  { %v1099_v25 = vpack.c.bf16 %v1035_v18, %v1035_v18  ;;  %v1004_v26 = vmax.f32 %v940_v19, 0.0  ;;  %v803_v27 = vadd.f32 %v802_v21, %v633_v20  ;;  %v556_v28 = vpop.f32.mrf.mxu0 }
  0xdf   :  { %v725_v30 = vpop.f32.mrf.mxu1 }
  0xe0   :  { %1164 = vst.msk [vmem:[#allocation2 + $0x98] sm:$0xf] %vm1125_vm0, %v1099_v25  ;;  %v1068_v31 = vpack.c.bf16 %v1004_v26, %v1004_v26  ;;  %v906_v32 = vmul.f32 %v1947_v59, %v803_v27  ;;  %v726_v33 = vadd.f32 %v725_v30, %v556_v28  ;;  %v1322_v26 = vld [vmem:[%s2327_s0 + $0xe0] sm:$0xf]  ;;  %v1557_v27 = vld [vmem:[%s2327_s0 + $0xe4] sm:$0xf0] }
  0xe1   :  { %595 = vmatmul.bf16.gmra.mxu0 %v1307_v22  ;;  %675 = vmatmul.bf16.gmra.mxu2 %v1435_v23  ;;  %v1450_v28 = vld [vmem:[%s2327_s0 + $0x1e0] sm:$0xf] }
  0xe2   :  { %1133 = vst.msk [vmem:[#allocation2 + $0x1c] sm:$0xf] %vm1125_vm0, %v1068_v31  ;;  %v972_v34 = vadd.f32 %v1952_v0, %v906_v32  ;;  %v875_v35 = vmul.f32 %v1947_v59, %v726_v33  ;;  %764 = vmatmul.bf16.gmra.mxu1 %v1311_v24  ;;  %844 = vmatmul.bf16.gmra.mxu3 %v1439_v29  ;;  %v1589_v29 = vld [vmem:[%s2327_s0 + $0x1e4] sm:$0xf0]  ;;  %v1556_v32 = vld [vmem:[%s2327_s0 + $0xe4] sm:$0xf] }
  0xe3   :  { %v1324_v33 = vld [vmem:[%s2327_s0 + $0xe8] sm:$0xf0] }
  0xe4   :  { %v1036_v36 = vmax.f32 %v972_v34, 0.0  ;;  %v941_v37 = vadd.f32 %v1952_v0, %v875_v35  ;;  %v636_v38 = vpop.f32.mrf.mxu2  ;;  %v1588_v34 = vld [vmem:[%s2327_s0 + $0x1e4] sm:$0xf]  ;;  %v1452_v35 = vld [vmem:[%s2327_s0 + $0x1e8] sm:$0xf0] }
  0xe5   :  { %v805_v39 = vpop.f32.mrf.mxu3 }
  0xe6   :  { %v1100_v40 = vpack.c.bf16 %v1036_v36, %v1036_v36  ;;  %v1005_v41 = vmax.f32 %v941_v37, 0.0  ;;  %v806_v42 = vadd.f32 %v805_v39, %v636_v38  ;;  %v558_v43 = vpop.f32.mrf.mxu0 }
  0xe7   :  { %v727_v44 = vpop.f32.mrf.mxu1 }
  0xe8   :  { %1165 = vst.msk [vmem:[#allocation2 + $0x9c] sm:$0xf] %vm1125_vm0, %v1100_v40  ;;  %v1069_v45 = vpack.c.bf16 %v1005_v41, %v1005_v41  ;;  %v907_v46 = vmul.f32 %v1947_v59, %v806_v42  ;;  %v728_v47 = vadd.f32 %v727_v44, %v558_v43  ;;  %v1323_v40 = vor.u32 %v1557_v27, %v1322_v26 }
  0xe9   :  { %v1451_v41 = vor.u32 %v1589_v29, %v1450_v28  ;;  %v1327_v42 = vor.u32 %v1556_v32, %v1324_v33 }
  0xea   :  { %1134 = vst.msk [vmem:[#allocation2 + $0x20] sm:$0xf] %vm1125_vm0, %v1069_v45  ;;  %v973_v52 = vadd.f32 %v1952_v0, %v907_v46  ;;  %v876_v53 = vmul.f32 %v1947_v59, %v728_v47  ;;  %v1455_v47 = vor.u32 %v1588_v34, %v1452_v35 }
  0xec   :  { %v1037_v58 = vmax.f32 %v973_v52, 0.0  ;;  %v942_v60 = vadd.f32 %v1952_v0, %v876_v53  ;;  %v638_v61 = vpop.f32.mrf.mxu2 }
  0xed   :  { %v807_v62 = vpop.f32.mrf.mxu3 }
  0xee   :  { %v1101_v3 = vpack.c.bf16 %v1037_v58, %v1037_v58  ;;  %v1006_v4 = vmax.f32 %v942_v60, 0.0  ;;  %v808_v5 = vadd.f32 %v807_v62, %v638_v61  ;;  %v561_v6 = vpop.f32.mrf.mxu0 }
  0xef   :  { %v730_v8 = vpop.f32.mrf.mxu1 }
  0xf0   :  { %1166 = vst.msk [vmem:[#allocation2 + $0xa0] sm:$0xf] %vm1125_vm0, %v1101_v3  ;;  %v1070_v9 = vpack.c.bf16 %v1006_v4, %v1006_v4  ;;  %v908_v10 = vmul.f32 %v1947_v59, %v808_v5  ;;  %v731_v11 = vadd.f32 %v730_v8, %v561_v6  ;;  %v1330_v4 = vld [vmem:[%s2327_s0 + $0xf0] sm:$0xf]  ;;  %v1559_v5 = vld [vmem:[%s2327_s0 + $0xf4] sm:$0xf0] }
  0xf1   :  { %600 = vmatmul.bf16.gmra.mxu0 %v1315_v63  ;;  %680 = vmatmul.bf16.gmra.mxu2 %v1443_v1  ;;  %v1458_v6 = vld [vmem:[%s2327_s0 + $0x1f0] sm:$0xf] }
  0xf2   :  { %1135 = vst.msk [vmem:[#allocation2 + $0x24] sm:$0xf] %vm1125_vm0, %v1070_v9  ;;  %v974_v12 = vadd.f32 %v1952_v0, %v908_v10  ;;  %v877_v13 = vmul.f32 %v1947_v59, %v731_v11  ;;  %769 = vmatmul.bf16.gmra.mxu1 %v1319_v2  ;;  %849 = vmatmul.bf16.gmra.mxu3 %v1447_v7  ;;  %v1591_v7 = vld [vmem:[%s2327_s0 + $0x1f4] sm:$0xf0]  ;;  %v1558_v10 = vld [vmem:[%s2327_s0 + $0xf4] sm:$0xf] }
  0xf3   :  { %v1332_v11 = vld [vmem:[%s2327_s0 + $0xf8] sm:$0xf0] }
  0xf4   :  { %v1038_v14 = vmax.f32 %v974_v12, 0.0  ;;  %v943_v15 = vadd.f32 %v1952_v0, %v877_v13  ;;  %v641_v16 = vpop.f32.mrf.mxu2  ;;  %v1590_v12 = vld [vmem:[%s2327_s0 + $0x1f4] sm:$0xf]  ;;  %v1460_v13 = vld [vmem:[%s2327_s0 + $0x1f8] sm:$0xf0] }
  0xf5   :  { %v810_v17 = vpop.f32.mrf.mxu3 }
  0xf6   :  { %v1102_v18 = vpack.c.bf16 %v1038_v14, %v1038_v14  ;;  %v1007_v19 = vmax.f32 %v943_v15, 0.0  ;;  %v811_v20 = vadd.f32 %v810_v17, %v641_v16  ;;  %v563_v21 = vpop.f32.mrf.mxu0 }
  0xf7   :  { %v732_v22 = vpop.f32.mrf.mxu1 }
  0xf8   :  { %1167 = vst.msk [vmem:[#allocation2 + $0xa4] sm:$0xf] %vm1125_vm0, %v1102_v18  ;;  %v1071_v23 = vpack.c.bf16 %v1007_v19, %v1007_v19  ;;  %v909_v24 = vmul.f32 %v1947_v59, %v811_v20  ;;  %v733_v25 = vadd.f32 %v732_v22, %v563_v21  ;;  %v1331_v18 = vor.u32 %v1559_v5, %v1330_v4 }
  0xf9   :  { %v1459_v19 = vor.u32 %v1591_v7, %v1458_v6  ;;  %v1335_v20 = vor.u32 %v1558_v10, %v1332_v11 }
  0xfa   :  { %1136 = vst.msk [vmem:[#allocation2 + $0x28] sm:$0xf] %vm1125_vm0, %v1071_v23  ;;  %v975_v30 = vadd.f32 %v1952_v0, %v909_v24  ;;  %v878_v31 = vmul.f32 %v1947_v59, %v733_v25  ;;  %v1463_v25 = vor.u32 %v1590_v12, %v1460_v13 }
  0xfc   :  { %v1039_v36 = vmax.f32 %v975_v30, 0.0  ;;  %v944_v37 = vadd.f32 %v1952_v0, %v878_v31  ;;  %v643_v38 = vpop.f32.mrf.mxu2 }
  0xfd   :  { %v812_v39 = vpop.f32.mrf.mxu3 }
  0xfe   :  { %v1103_v43 = vpack.c.bf16 %v1039_v36, %v1039_v36  ;;  %v1008_v44 = vmax.f32 %v944_v37, 0.0  ;;  %v813_v45 = vadd.f32 %v812_v39, %v643_v38  ;;  %v566_v46 = vpop.f32.mrf.mxu0 }
  0xff   :  { %v735_v48 = vpop.f32.mrf.mxu1 }
 0x100   :  { %1168 = vst.msk [vmem:[#allocation2 + $0xa8] sm:$0xf] %vm1125_vm0, %v1103_v43  ;;  %v1072_v49 = vpack.c.bf16 %v1008_v44, %v1008_v44  ;;  %v910_v50 = vmul.f32 %v1947_v59, %v813_v45  ;;  %v736_v51 = vadd.f32 %v735_v48, %v566_v46 }
 0x101   :  { %605 = vmatmul.bf16.gmra.mxu0 %v1323_v40  ;;  %685 = vmatmul.bf16.gmra.mxu2 %v1451_v41 }
 0x102   :  { %1137 = vst.msk [vmem:[#allocation2 + $0x2c] sm:$0xf] %vm1125_vm0, %v1072_v49  ;;  %v976_v52 = vadd.f32 %v1952_v0, %v910_v50  ;;  %v879_v53 = vmul.f32 %v1947_v59, %v736_v51  ;;  %774 = vmatmul.bf16.gmra.mxu1 %v1327_v42  ;;  %854 = vmatmul.bf16.gmra.mxu3 %v1455_v47 }
 0x104   :  { %v1040_v54 = vmax.f32 %v976_v52, 0.0  ;;  %v945_v55 = vadd.f32 %v1952_v0, %v879_v53  ;;  %v646_v56 = vpop.f32.mrf.mxu2 }
 0x105   :  { %v815_v57 = vpop.f32.mrf.mxu3 }
 0x106   :  { %v1104_v58 = vpack.c.bf16 %v1040_v54, %v1040_v54  ;;  %v1009_v60 = vmax.f32 %v945_v55, 0.0  ;;  %v816_v61 = vadd.f32 %v815_v57, %v646_v56  ;;  %v568_v62 = vpop.f32.mrf.mxu0 }
 0x107   :  { %v737_v63 = vpop.f32.mrf.mxu1 }
 0x108   :  { %1169 = vst.msk [vmem:[#allocation2 + $0xac] sm:$0xf] %vm1125_vm0, %v1104_v58  ;;  %v1073_v1 = vpack.c.bf16 %v1009_v60, %v1009_v60  ;;  %v911_v2 = vmul.f32 %v1947_v59, %v816_v61  ;;  %v738_v3 = vadd.f32 %v737_v63, %v568_v62 }
 0x10a   :  { %1138 = vst.msk [vmem:[#allocation2 + $0x30] sm:$0xf] %vm1125_vm0, %v1073_v1  ;;  %v977_v8 = vadd.f32 %v1952_v0, %v911_v2  ;;  %v880_v9 = vmul.f32 %v1947_v59, %v738_v3 }
 0x10c   :  { %v1041_v14 = vmax.f32 %v977_v8, 0.0  ;;  %v946_v15 = vadd.f32 %v1952_v0, %v880_v9  ;;  %v648_v16 = vpop.f32.mrf.mxu2 }
 0x10d   :  { %v817_v17 = vpop.f32.mrf.mxu3 }
 0x10e   :  { %v1105_v21 = vpack.c.bf16 %v1041_v14, %v1041_v14  ;;  %v1010_v22 = vmax.f32 %v946_v15, 0.0  ;;  %v818_v23 = vadd.f32 %v817_v17, %v648_v16  ;;  %v571_v24 = vpop.f32.mrf.mxu0 }
 0x10f   :  { %v740_v26 = vpop.f32.mrf.mxu1 }
 0x110   :  { %1170 = vst.msk [vmem:[#allocation2 + $0xb0] sm:$0xf] %vm1125_vm0, %v1105_v21  ;;  %v1074_v27 = vpack.c.bf16 %v1010_v22, %v1010_v22  ;;  %v912_v28 = vmul.f32 %v1947_v59, %v818_v23  ;;  %v741_v29 = vadd.f32 %v740_v26, %v571_v24 }
 0x111   :  { %610 = vmatmul.bf16.gmra.mxu0 %v1331_v18  ;;  %690 = vmatmul.bf16.gmra.mxu2 %v1459_v19 }
 0x112   :  { %1139 = vst.msk [vmem:[#allocation2 + $0x34] sm:$0xf] %vm1125_vm0, %v1074_v27  ;;  %v978_v30 = vadd.f32 %v1952_v0, %v912_v28  ;;  %v881_v31 = vmul.f32 %v1947_v59, %v741_v29  ;;  %779 = vmatmul.bf16.gmra.mxu1 %v1335_v20  ;;  %859 = vmatmul.bf16.gmra.mxu3 %v1463_v25 }
 0x114   :  { %v1042_v32 = vmax.f32 %v978_v30, 0.0  ;;  %v947_v33 = vadd.f32 %v1952_v0, %v881_v31  ;;  %v651_v34 = vpop.f32.mrf.mxu2 }
 0x115   :  { %v820_v35 = vpop.f32.mrf.mxu3 }
 0x116   :  { %v1106_v36 = vpack.c.bf16 %v1042_v32, %v1042_v32  ;;  %v1011_v37 = vmax.f32 %v947_v33, 0.0  ;;  %v821_v38 = vadd.f32 %v820_v35, %v651_v34  ;;  %v573_v39 = vpop.f32.mrf.mxu0 }
 0x117   :  { %v742_v40 = vpop.f32.mrf.mxu1 }
 0x118   :  { %1171 = vst.msk [vmem:[#allocation2 + $0xb4] sm:$0xf] %vm1125_vm0, %v1106_v36  ;;  %v1075_v41 = vpack.c.bf16 %v1011_v37, %v1011_v37  ;;  %v913_v42 = vmul.f32 %v1947_v59, %v821_v38  ;;  %v743_v43 = vadd.f32 %v742_v40, %v573_v39 }
 0x11a   :  { %1140 = vst.msk [vmem:[#allocation2 + $0x38] sm:$0xf] %vm1125_vm0, %v1075_v41  ;;  %v979_v44 = vadd.f32 %v1952_v0, %v913_v42  ;;  %v882_v45 = vmul.f32 %v1947_v59, %v743_v43 }
 0x11c   :  { %v1043_v46 = vmax.f32 %v979_v44, 0.0  ;;  %v948_v47 = vadd.f32 %v1952_v0, %v882_v45  ;;  %v653_v48 = vpop.f32.mrf.mxu2 }
 0x11d   :  { %v822_v49 = vpop.f32.mrf.mxu3 }
 0x11e   :  { %v1107_v50 = vpack.c.bf16 %v1043_v46, %v1043_v46  ;;  %v1012_v51 = vmax.f32 %v948_v47, 0.0  ;;  %v823_v52 = vadd.f32 %v822_v49, %v653_v48  ;;  %v576_v53 = vpop.f32.mrf.mxu0 }
 0x11f   :  { %v745_v54 = vpop.f32.mrf.mxu1 }
 0x120   :  { %1172 = vst.msk [vmem:[#allocation2 + $0xb8] sm:$0xf] %vm1125_vm0, %v1107_v50  ;;  %v1076_v55 = vpack.c.bf16 %v1012_v51, %v1012_v51  ;;  %v914_v56 = vmul.f32 %v1947_v59, %v823_v52  ;;  %v746_v57 = vadd.f32 %v745_v54, %v576_v53 }
 0x122   :  { %1141 = vst.msk [vmem:[#allocation2 + $0x3c] sm:$0xf] %vm1125_vm0, %v1076_v55  ;;  %v980_v58 = vadd.f32 %v1952_v0, %v914_v56  ;;  %v883_v60 = vmul.f32 %v1947_v59, %v746_v57 }
 0x124   :  { %v1044_v61 = vmax.f32 %v980_v58, 0.0  ;;  %v949_v62 = vadd.f32 %v1952_v0, %v883_v60  ;;  %v656_v63 = vpop.f32.mrf.mxu2 }
 0x125   :  { %v825_v1 = vpop.f32.mrf.mxu3 }
 0x126   :  { %v1108_v2 = vpack.c.bf16 %v1044_v61, %v1044_v61  ;;  %v1013_v3 = vmax.f32 %v949_v62, 0.0  ;;  %v826_v4 = vadd.f32 %v825_v1, %v656_v63  ;;  %v578_v5 = vpop.f32.mrf.mxu0 }
 0x127   :  { %v747_v6 = vpop.f32.mrf.mxu1 }
 0x128   :  { %1173 = vst.msk [vmem:[#allocation2 + $0xbc] sm:$0xf] %vm1125_vm0, %v1108_v2  ;;  %v1077_v7 = vpack.c.bf16 %v1013_v3, %v1013_v3  ;;  %v915_v8 = vmul.f32 %v1947_v59, %v826_v4  ;;  %v748_v9 = vadd.f32 %v747_v6, %v578_v5 }
 0x12a   :  { %1142 = vst.msk [vmem:[#allocation2 + $0x40] sm:$0xf] %vm1125_vm0, %v1077_v7  ;;  %v981_v10 = vadd.f32 %v1952_v0, %v915_v8  ;;  %v884_v11 = vmul.f32 %v1947_v59, %v748_v9 }
 0x12c   :  { %v1045_v12 = vmax.f32 %v981_v10, 0.0  ;;  %v950_v13 = vadd.f32 %v1952_v0, %v884_v11  ;;  %v658_v14 = vpop.f32.mrf.mxu2 }
 0x12d   :  { %v827_v15 = vpop.f32.mrf.mxu3 }
 0x12e   :  { %v1109_v16 = vpack.c.bf16 %v1045_v12, %v1045_v12  ;;  %v1014_v17 = vmax.f32 %v950_v13, 0.0  ;;  %v828_v18 = vadd.f32 %v827_v15, %v658_v14  ;;  %v581_v19 = vpop.f32.mrf.mxu0 }
 0x12f   :  { %v750_v20 = vpop.f32.mrf.mxu1 }
 0x130   :  { %1174 = vst.msk [vmem:[#allocation2 + $0xc0] sm:$0xf] %vm1125_vm0, %v1109_v16  ;;  %v1078_v21 = vpack.c.bf16 %v1014_v17, %v1014_v17  ;;  %v916_v22 = vmul.f32 %v1947_v59, %v828_v18  ;;  %v751_v23 = vadd.f32 %v750_v20, %v581_v19 }
 0x132   :  { %1143 = vst.msk [vmem:[#allocation2 + $0x44] sm:$0xf] %vm1125_vm0, %v1078_v21  ;;  %v982_v24 = vadd.f32 %v1952_v0, %v916_v22  ;;  %v885_v25 = vmul.f32 %v1947_v59, %v751_v23 }
 0x134   :  { %v1046_v26 = vmax.f32 %v982_v24, 0.0  ;;  %v951_v27 = vadd.f32 %v1952_v0, %v885_v25  ;;  %v661_v28 = vpop.f32.mrf.mxu2 }
 0x135   :  { %v830_v29 = vpop.f32.mrf.mxu3 }
 0x136   :  { %v1110_v30 = vpack.c.bf16 %v1046_v26, %v1046_v26  ;;  %v1015_v31 = vmax.f32 %v951_v27, 0.0  ;;  %v831_v32 = vadd.f32 %v830_v29, %v661_v28  ;;  %v583_v33 = vpop.f32.mrf.mxu0 }
 0x137   :  { %v752_v34 = vpop.f32.mrf.mxu1 }
 0x138   :  { %1175 = vst.msk [vmem:[#allocation2 + $0xc4] sm:$0xf] %vm1125_vm0, %v1110_v30  ;;  %v1079_v35 = vpack.c.bf16 %v1015_v31, %v1015_v31  ;;  %v917_v36 = vmul.f32 %v1947_v59, %v831_v32  ;;  %v753_v37 = vadd.f32 %v752_v34, %v583_v33 }
 0x13a   :  { %1144 = vst.msk [vmem:[#allocation2 + $0x48] sm:$0xf] %vm1125_vm0, %v1079_v35  ;;  %v983_v38 = vadd.f32 %v1952_v0, %v917_v36  ;;  %v886_v39 = vmul.f32 %v1947_v59, %v753_v37 }
 0x13c   :  { %v1047_v40 = vmax.f32 %v983_v38, 0.0  ;;  %v952_v41 = vadd.f32 %v1952_v0, %v886_v39  ;;  %v663_v42 = vpop.f32.mrf.mxu2 }
 0x13d   :  { %v832_v43 = vpop.f32.mrf.mxu3 }
 0x13e   :  { %v1111_v44 = vpack.c.bf16 %v1047_v40, %v1047_v40  ;;  %v1016_v45 = vmax.f32 %v952_v41, 0.0  ;;  %v833_v46 = vadd.f32 %v832_v43, %v663_v42  ;;  %v586_v47 = vpop.f32.mrf.mxu0 }
 0x13f   :  { %v755_v48 = vpop.f32.mrf.mxu1 }
 0x140   :  { %1176 = vst.msk [vmem:[#allocation2 + $0xc8] sm:$0xf] %vm1125_vm0, %v1111_v44  ;;  %v1080_v49 = vpack.c.bf16 %v1016_v45, %v1016_v45  ;;  %v918_v50 = vmul.f32 %v1947_v59, %v833_v46  ;;  %v756_v51 = vadd.f32 %v755_v48, %v586_v47 }
 0x142   :  { %1145 = vst.msk [vmem:[#allocation2 + $0x4c] sm:$0xf] %vm1125_vm0, %v1080_v49  ;;  %v984_v52 = vadd.f32 %v1952_v0, %v918_v50  ;;  %v887_v53 = vmul.f32 %v1947_v59, %v756_v51 }
 0x144   :  { %v1048_v54 = vmax.f32 %v984_v52, 0.0  ;;  %v953_v55 = vadd.f32 %v1952_v0, %v887_v53  ;;  %v666_v56 = vpop.f32.mrf.mxu2 }
 0x145   :  { %v835_v57 = vpop.f32.mrf.mxu3 }
 0x146   :  { %v1112_v58 = vpack.c.bf16 %v1048_v54, %v1048_v54  ;;  %v1017_v60 = vmax.f32 %v953_v55, 0.0  ;;  %v836_v61 = vadd.f32 %v835_v57, %v666_v56  ;;  %v588_v62 = vpop.f32.mrf.mxu0 }
 0x147   :  { %v757_v63 = vpop.f32.mrf.mxu1 }
 0x148   :  { %1177 = vst.msk [vmem:[#allocation2 + $0xcc] sm:$0xf] %vm1125_vm0, %v1112_v58  ;;  %v1081_v1 = vpack.c.bf16 %v1017_v60, %v1017_v60  ;;  %v919_v2 = vmul.f32 %v1947_v59, %v836_v61  ;;  %v758_v3 = vadd.f32 %v757_v63, %v588_v62  ;;  %v2271_v58 = vld [vmem:[%s2329_s2] ss:$0 sm:$0xff] }
 0x14a   :  { %1146 = vst.msk [vmem:[#allocation2 + $0x50] sm:$0xf] %vm1125_vm0, %v1081_v1  ;;  %v985_v4 = vadd.f32 %v1952_v0, %v919_v2  ;;  %v888_v5 = vmul.f32 %v1947_v59, %v758_v3 }
 0x14c   :  { %v1049_v6 = vmax.f32 %v985_v4, 0.0  ;;  %v954_v7 = vadd.f32 %v1952_v0, %v888_v5  ;;  %v668_v8 = vpop.f32.mrf.mxu2 }
 0x14d   :  { %v837_v9 = vpop.f32.mrf.mxu3 }
 0x14e   :  { %v1113_v10 = vpack.c.bf16 %v1049_v6, %v1049_v6  ;;  %v1018_v11 = vmax.f32 %v954_v7, 0.0  ;;  %v838_v12 = vadd.f32 %v837_v9, %v668_v8  ;;  %v591_v13 = vpop.f32.mrf.mxu0 }
 0x14f   :  { %v760_v14 = vpop.f32.mrf.mxu1 }
 0x150   :  { %1178 = vst.msk [vmem:[#allocation2 + $0xd0] sm:$0xf] %vm1125_vm0, %v1113_v10  ;;  %v1082_v15 = vpack.c.bf16 %v1018_v11, %v1018_v11  ;;  %v920_v16 = vmul.f32 %v1947_v59, %v838_v12  ;;  %v761_v17 = vadd.f32 %v760_v14, %v591_v13 }
 0x152   :  { %1147 = vst.msk [vmem:[#allocation2 + $0x54] sm:$0xf] %vm1125_vm0, %v1082_v15  ;;  %v986_v18 = vadd.f32 %v1952_v0, %v920_v16  ;;  %v889_v19 = vmul.f32 %v1947_v59, %v761_v17 }
 0x154   :  { %v1050_v20 = vmax.f32 %v986_v18, 0.0  ;;  %v955_v21 = vadd.f32 %v1952_v0, %v889_v19  ;;  %v671_v22 = vpop.f32.mrf.mxu2 }
 0x155   :  { %v840_v23 = vpop.f32.mrf.mxu3 }
 0x156   :  { %v1114_v24 = vpack.c.bf16 %v1050_v20, %v1050_v20  ;;  %v1019_v25 = vmax.f32 %v955_v21, 0.0  ;;  %v841_v26 = vadd.f32 %v840_v23, %v671_v22  ;;  %v593_v27 = vpop.f32.mrf.mxu0 }
 0x157   :  { %v762_v28 = vpop.f32.mrf.mxu1 }
 0x158   :  { %1179 = vst.msk [vmem:[#allocation2 + $0xd4] sm:$0xf] %vm1125_vm0, %v1114_v24  ;;  %v1083_v29 = vpack.c.bf16 %v1019_v25, %v1019_v25  ;;  %v921_v30 = vmul.f32 %v1947_v59, %v841_v26  ;;  %v763_v31 = vadd.f32 %v762_v28, %v593_v27 }
 0x15a   :  { %1148 = vst.msk [vmem:[#allocation2 + $0x58] sm:$0xf] %vm1125_vm0, %v1083_v29  ;;  %v987_v32 = vadd.f32 %v1952_v0, %v921_v30  ;;  %v890_v33 = vmul.f32 %v1947_v59, %v763_v31 }
 0x15c   :  { %v1051_v34 = vmax.f32 %v987_v32, 0.0  ;;  %v956_v35 = vadd.f32 %v1952_v0, %v890_v33  ;;  %v673_v36 = vpop.f32.mrf.mxu2 }
 0x15d   :  { %v842_v37 = vpop.f32.mrf.mxu3 }
 0x15e   :  { %v1115_v38 = vpack.c.bf16 %v1051_v34, %v1051_v34  ;;  %v1020_v39 = vmax.f32 %v956_v35, 0.0  ;;  %v843_v40 = vadd.f32 %v842_v37, %v673_v36  ;;  %v596_v41 = vpop.f32.mrf.mxu0 }
 0x15f   :  { %v765_v42 = vpop.f32.mrf.mxu1 }
 0x160   :  { %1180 = vst.msk [vmem:[#allocation2 + $0xd8] sm:$0xf] %vm1125_vm0, %v1115_v38  ;;  %v1084_v43 = vpack.c.bf16 %v1020_v39, %v1020_v39  ;;  %v922_v44 = vmul.f32 %v1947_v59, %v843_v40  ;;  %v766_v45 = vadd.f32 %v765_v42, %v596_v41 }
 0x162   :  { %1149 = vst.msk [vmem:[#allocation2 + $0x5c] sm:$0xf] %vm1125_vm0, %v1084_v43  ;;  %v988_v46 = vadd.f32 %v1952_v0, %v922_v44  ;;  %v891_v47 = vmul.f32 %v1947_v59, %v766_v45 }
 0x164   :  { %v1052_v48 = vmax.f32 %v988_v46, 0.0  ;;  %v957_v49 = vadd.f32 %v1952_v0, %v891_v47  ;;  %v676_v50 = vpop.f32.mrf.mxu2  ;;  %v2278_v0 = vld [vmem:[%s2329_s2 + $0x1] ss:$0 sm:$0xff]  ;;  %s1657_s2 = smov [#allocation2]  }
 0x165   :  { %v845_v51 = vpop.f32.mrf.mxu3  ;;  %s1194_s27 = sshll.u32 %s1657_s2, 4  ;;  %s1195_s27 = int_to_ptr.vmem [resolvable:$true] %s1194_s27 }
 0x166   :  { %v1116_v52 = vpack.c.bf16 %v1052_v48, %v1052_v48  ;;  %v1021_v53 = vmax.f32 %v957_v49, 0.0  ;;  %v846_v54 = vadd.f32 %v845_v51, %v676_v50  ;;  %v598_v55 = vpop.f32.mrf.mxu0 }
 0x167   :  { %v767_v56 = vpop.f32.mrf.mxu1 }
 0x168   :  { %1181 = vst.msk [vmem:[#allocation2 + $0xdc] sm:$0xf] %vm1125_vm0, %v1116_v52  ;;  %v1085_v57 = vpack.c.bf16 %v1021_v53, %v1021_v53  ;;  %v923_v59 = vmul.f32 %v2271_v58, %v846_v54  ;;  %v768_v60 = vadd.f32 %v767_v56, %v598_v55 }
 0x16a   :  { %1150 = vst.msk [vmem:[#allocation2 + $0x60] sm:$0xf] %vm1125_vm0, %v1085_v57  ;;  %v989_v61 = vadd.f32 %v2278_v0, %v923_v59  ;;  %v892_v62 = vmul.f32 %v2271_v58, %v768_v60 }
 0x16c   :  { %v1053_v63 = vmax.f32 %v989_v61, 0.0  ;;  %v958_v1 = vadd.f32 %v2278_v0, %v892_v62  ;;  %v678_v2 = vpop.f32.mrf.mxu2 }
 0x16d   :  { %v847_v3 = vpop.f32.mrf.mxu3 }
 0x16e   :  { %v1117_v4 = vpack.c.bf16 %v1053_v63, %v1053_v63  ;;  %v1022_v5 = vmax.f32 %v958_v1, 0.0  ;;  %v848_v6 = vadd.f32 %v847_v3, %v678_v2  ;;  %v601_v7 = vpop.f32.mrf.mxu0 }
 0x16f   :  { %v770_v8 = vpop.f32.mrf.mxu1 }
 0x170   :  { %1182 = vst.msk [vmem:[#allocation2 + $0xe0] sm:$0xf] %vm1125_vm0, %v1117_v4  ;;  %v1086_v9 = vpack.c.bf16 %v1022_v5, %v1022_v5  ;;  %v924_v10 = vmul.f32 %v2271_v58, %v848_v6  ;;  %v771_v11 = vadd.f32 %v770_v8, %v601_v7 }
 0x172   :  { %1151 = vst.msk [vmem:[#allocation2 + $0x64] sm:$0xf] %vm1125_vm0, %v1086_v9  ;;  %v990_v12 = vadd.f32 %v2278_v0, %v924_v10  ;;  %v893_v13 = vmul.f32 %v2271_v58, %v771_v11 }
 0x174   :  { %v1054_v14 = vmax.f32 %v990_v12, 0.0  ;;  %v959_v15 = vadd.f32 %v2278_v0, %v893_v13  ;;  %v681_v16 = vpop.f32.mrf.mxu2 }
 0x175   :  { %v850_v17 = vpop.f32.mrf.mxu3 }
 0x176   :  { %v1118_v18 = vpack.c.bf16 %v1054_v14, %v1054_v14  ;;  %v1023_v19 = vmax.f32 %v959_v15, 0.0  ;;  %v851_v20 = vadd.f32 %v850_v17, %v681_v16  ;;  %v603_v21 = vpop.f32.mrf.mxu0 }
 0x177   :  { %v772_v22 = vpop.f32.mrf.mxu1 }
 0x178   :  { %1183 = vst.msk [vmem:[#allocation2 + $0xe4] sm:$0xf] %vm1125_vm0, %v1118_v18  ;;  %v1087_v23 = vpack.c.bf16 %v1023_v19, %v1023_v19  ;;  %v925_v24 = vmul.f32 %v2271_v58, %v851_v20  ;;  %v773_v25 = vadd.f32 %v772_v22, %v603_v21 }
 0x17a   :  { %1152 = vst.msk [vmem:[#allocation2 + $0x68] sm:$0xf] %vm1125_vm0, %v1087_v23  ;;  %v991_v26 = vadd.f32 %v2278_v0, %v925_v24  ;;  %v894_v27 = vmul.f32 %v2271_v58, %v773_v25 }
 0x17c   :  { %v1055_v28 = vmax.f32 %v991_v26, 0.0  ;;  %v960_v29 = vadd.f32 %v2278_v0, %v894_v27  ;;  %v683_v30 = vpop.f32.mrf.mxu2 }
 0x17d   :  { %v852_v31 = vpop.f32.mrf.mxu3 }
 0x17e   :  { %v1119_v32 = vpack.c.bf16 %v1055_v28, %v1055_v28  ;;  %v1024_v33 = vmax.f32 %v960_v29, 0.0  ;;  %v853_v34 = vadd.f32 %v852_v31, %v683_v30  ;;  %v606_v35 = vpop.f32.mrf.mxu0 }
 0x17f   :  { %v775_v36 = vpop.f32.mrf.mxu1 }
 0x180   :  { %1184 = vst.msk [vmem:[#allocation2 + $0xe8] sm:$0xf] %vm1125_vm0, %v1119_v32  ;;  %v1088_v37 = vpack.c.bf16 %v1024_v33, %v1024_v33  ;;  %v926_v38 = vmul.f32 %v2271_v58, %v853_v34  ;;  %v776_v39 = vadd.f32 %v775_v36, %v606_v35 }
 0x182   :  { %1153 = vst.msk [vmem:[#allocation2 + $0x6c] sm:$0xf] %vm1125_vm0, %v1088_v37  ;;  %v992_v40 = vadd.f32 %v2278_v0, %v926_v38  ;;  %v895_v41 = vmul.f32 %v2271_v58, %v776_v39 }
 0x184   :  { %v1056_v42 = vmax.f32 %v992_v40, 0.0  ;;  %v961_v43 = vadd.f32 %v2278_v0, %v895_v41  ;;  %v686_v44 = vpop.f32.mrf.mxu2 }
 0x185   :  { %v855_v45 = vpop.f32.mrf.mxu3 }
 0x186   :  { %v1120_v46 = vpack.c.bf16 %v1056_v42, %v1056_v42  ;;  %v1025_v47 = vmax.f32 %v961_v43, 0.0  ;;  %v856_v48 = vadd.f32 %v855_v45, %v686_v44  ;;  %v608_v49 = vpop.f32.mrf.mxu0 }
 0x187   :  { %v777_v50 = vpop.f32.mrf.mxu1 }
 0x188   :  { %1185 = vst.msk [vmem:[#allocation2 + $0xec] sm:$0xf] %vm1125_vm0, %v1120_v46  ;;  %v1089_v51 = vpack.c.bf16 %v1025_v47, %v1025_v47  ;;  %v927_v52 = vmul.f32 %v2271_v58, %v856_v48  ;;  %v778_v53 = vadd.f32 %v777_v50, %v608_v49 }
 0x18a   :  { %1154 = vst.msk [vmem:[#allocation2 + $0x70] sm:$0xf] %vm1125_vm0, %v1089_v51  ;;  %v993_v54 = vadd.f32 %v2278_v0, %v927_v52  ;;  %v896_v55 = vmul.f32 %v2271_v58, %v778_v53 }
 0x18c   :  { %v1057_v56 = vmax.f32 %v993_v54, 0.0  ;;  %v962_v57 = vadd.f32 %v2278_v0, %v896_v55  ;;  %v688_v59 = vpop.f32.mrf.mxu2 }
 0x18d   :  { %v857_v60 = vpop.f32.mrf.mxu3 }
 0x18e   :  { %v1121_v61 = vpack.c.bf16 %v1057_v56, %v1057_v56  ;;  %v1026_v62 = vmax.f32 %v962_v57, 0.0  ;;  %v858_v63 = vadd.f32 %v857_v60, %v688_v59  ;;  %v611_v1 = vpop.f32.mrf.mxu0 }
 0x18f   :  { %v780_v2 = vpop.f32.mrf.mxu1 }
 0x190   :  { %1186 = vst.msk [vmem:[#allocation2 + $0xf0] sm:$0xf] %vm1125_vm0, %v1121_v61  ;;  %v1090_v3 = vpack.c.bf16 %v1026_v62, %v1026_v62  ;;  %v928_v4 = vmul.f32 %v2271_v58, %v858_v63  ;;  %v781_v5 = vadd.f32 %v780_v2, %v611_v1 }
 0x192   :  { %1155 = vst.msk [vmem:[#allocation2 + $0x74] sm:$0xf] %vm1125_vm0, %v1090_v3  ;;  %v994_v6 = vadd.f32 %v2278_v0, %v928_v4  ;;  %v897_v7 = vmul.f32 %v2271_v58, %v781_v5 }
 0x194   :  { %v1058_v8 = vmax.f32 %v994_v6, 0.0  ;;  %v963_v9 = vadd.f32 %v2278_v0, %v897_v7  ;;  %v691_v10 = vpop.f32.mrf.mxu2 }
 0x195   :  { %v860_v11 = vpop.f32.mrf.mxu3 }
 0x196   :  { %v1122_v12 = vpack.c.bf16 %v1058_v8, %v1058_v8  ;;  %v1027_v13 = vmax.f32 %v963_v9, 0.0  ;;  %v861_v14 = vadd.f32 %v860_v11, %v691_v10  ;;  %v613_v15 = vpop.f32.mrf.mxu0 }
 0x197   :  { %v782_v16 = vpop.f32.mrf.mxu1 }
 0x198   :  { %1187 = vst.msk [vmem:[#allocation2 + $0xf4] sm:$0xf] %vm1125_vm0, %v1122_v12  ;;  %v1091_v17 = vpack.c.bf16 %v1027_v13, %v1027_v13  ;;  %v929_v18 = vmul.f32 %v2271_v58, %v861_v14  ;;  %v783_v19 = vadd.f32 %v782_v16, %v613_v15 }
 0x19a   :  { %1156 = vst.msk [vmem:[#allocation2 + $0x78] sm:$0xf] %vm1125_vm0, %v1091_v17  ;;  %v995_v20 = vadd.f32 %v2278_v0, %v929_v18  ;;  %v898_v21 = vmul.f32 %v2271_v58, %v783_v19 }
 0x19c   :  { %v1059_v22 = vmax.f32 %v995_v20, 0.0  ;;  %v964_v23 = vadd.f32 %v2278_v0, %v898_v21  ;;  %v693_v24 = vpop.f32.mrf.mxu2 }
 0x19d   :  { %v862_v25 = vpop.f32.mrf.mxu3 }
 0x19e   :  { %v1123_v26 = vpack.c.bf16 %v1059_v22, %v1059_v22  ;;  %v1028_v27 = vmax.f32 %v964_v23, 0.0  ;;  %v863_v28 = vadd.f32 %v862_v25, %v693_v24 }
 0x1a0   :  { %1188 = vst.msk [vmem:[#allocation2 + $0xf8] sm:$0xf] %vm1125_vm0, %v1123_v26  ;;  %v1092_v29 = vpack.c.bf16 %v1028_v27, %v1028_v27  ;;  %v930_v30 = vmul.f32 %v2271_v58, %v863_v28 }
 0x1a2   :  { %1157 = vst.msk [vmem:[#allocation2 + $0x7c] sm:$0xf] %vm1125_vm0, %v1092_v29  ;;  %v996_v31 = vadd.f32 %v2278_v0, %v930_v30 }
 0x1a4   :  { %v1060_v32 = vmax.f32 %v996_v31, 0.0 }
 0x1a6   :  { %v1124_v33 = vpack.c.bf16 %v1060_v32, %v1060_v32 }
 0x1a8   :  { %1189 = vst.msk [vmem:[#allocation2 + $0xfc] sm:$0xf] %vm1125_vm0, %v1124_v33 }
 0x1a9   :  { %1202 = dma.vmem_to_hbm [thread:$0]  %s1195_s27, 4096, %s1197_s30, [#allocation3], %s1658_s4, %s1658_s4, %s1659_s5  }
 0x1aa   :  { %1655 = dma.done.wait [#allocation3], 4096  }
 0x1ab   :  { %1656 = vsyncadd [#allocation3], 4294963200 }
 0x1ac   :  { %1207 = vsyncpa [#allocation3], 1 }

</bundles_post_ra>
